<compile_context>
chip_gen: v5e
topology: v5e:2x2
jax: 0.10.0
libtpu: 0.0.40
codegen_flags: <defaults>
</compile_context>

<pallas_src>
import jax
import jax.numpy as jnp
from jax.experimental import pallas as pl
from jax.experimental.pallas import tpu as pltpu

BN_EPS = 1e-5
LANE = 128


def _regressorv2_kernel(x_ref, *refs):
    # refs = [(w, gamma, beta) x 5, w6, b6, out]
    o_ref = refs[-1]
    p = refs[:-1]

    def linear(h, w_ref):
        # bf16 MXU operands, f32 accumulation.
        return jnp.dot(h.astype(jnp.bfloat16), w_ref[...],
                       preferred_element_type=jnp.float32)

    def bn_relu(z, g_ref, beta_ref):
        # Training-mode BatchNorm1d over the batch dim (biased variance),
        # single-pass stats, fused into one scale/shift + relu.
        inv_n = 1.0 / z.shape[0]
        mean = jnp.sum(z, axis=0, keepdims=True) * inv_n
        ex2 = jnp.sum(z * z, axis=0, keepdims=True) * inv_n
        var = jnp.maximum(ex2 - mean * mean, 0.0)
        scale = g_ref[...] * jax.lax.rsqrt(var + BN_EPS)
        shift = beta_ref[...] - mean * scale
        return jnp.maximum(z * scale + shift, 0.0)

    h = x_ref[...]
    for layer in range(5):
        w_ref, g_ref, beta_ref = p[3 * layer : 3 * layer + 3]
        h = bn_relu(linear(h, w_ref), g_ref, beta_ref)

    w6_ref, b6_ref = p[15], p[16]
    logits = linear(h, w6_ref) + b6_ref[...]
    o_ref[...] = jax.nn.sigmoid(logits).astype(o_ref.dtype)


def _pick_batch_tile(batch, max_tile):
    """Largest tile <= max_tile that divides batch (multiple of 8), else full batch."""
    if batch <= max_tile:
        return batch
    t = max_tile - (max_tile % 8)
    while t >= 8:
        if batch % t == 0:
            return t
        t -= 8
    return batch


def regressorv2_forward(x, params, output_size, *, max_tile=1024):
    """params: flat list [w1,g1,beta1, ..., w5,g5,beta5, w6_padded,b6_padded].

    max_tile=1024 keeps the per-step VMEM footprint a few MiB, well inside the
    scoped limit on every generation (incl. v7x's 64 MiB physical VMEM).
    """
    batch, in_size = x.shape
    hidden = params[0].shape[1]
    out_pad = params[-1].shape[1]          # fc6 fan_out padded to a lane multiple

    tile_b = _pick_batch_tile(batch, max_tile)
    num_tiles = batch // tile_b

    const_map = lambda i: (0, 0)           # weights / BN params: VMEM-resident
    in_specs = [pl.BlockSpec((tile_b, in_size), lambda i: (i, 0))]
    dims = [in_size] + [hidden] * 5
    for layer in range(5):
        in_specs += [
            pl.BlockSpec((dims[layer], hidden), const_map),   # w
            pl.BlockSpec((1, hidden), const_map),             # gamma
            pl.BlockSpec((1, hidden), const_map),             # beta
        ]
    in_specs += [
        pl.BlockSpec((hidden, out_pad), const_map),           # w6 (padded)
        pl.BlockSpec((1, out_pad), const_map),                # b6 (padded)
    ]

    padded_out = pl.pallas_call(
        _regressorv2_kernel,
        out_shape=jax.ShapeDtypeStruct((batch, out_pad), jnp.float32),
        grid=(num_tiles,),
        in_specs=in_specs,
        out_specs=pl.BlockSpec((tile_b, out_pad), lambda i: (i, 0)),
        compiler_params=pltpu.CompilerParams(
            dimension_semantics=("parallel",)),
    )(x, *params)
    return padded_out[:, :output_size]


def make_params(key, input_size, hidden_size, output_size, out_pad):
    """Deterministic synthetic parameters (PyTorch-Linear-style uniform init).

    fc1..fc5 biases are intentionally omitted: BatchNorm in training mode
    cancels them exactly.  Weights are stored bf16 (MXU operands); BN affine
    params and the fc6 bias stay f32.  fc6 weight/bias are lane-padded with
    zeros to `out_pad` columns.
    """
    dims = [input_size] + [hidden_size] * 5
    params = []
    for i in range(5):
        fan_in, fan_out = dims[i], hidden_size
        key, kw, kg, kb = jax.random.split(key, 4)
        bound = 1.0 / (fan_in ** 0.5)
        w = jax.random.uniform(kw, (fan_in, fan_out), jnp.float32, -bound, bound)
        g = 1.0 + 0.1 * jax.random.normal(kg, (1, fan_out), jnp.float32)
        beta = 0.1 * jax.random.normal(kb, (1, fan_out), jnp.float32)
        params += [w.astype(jnp.bfloat16), g, beta]

    key, kw, kb = jax.random.split(key, 3)
    bound = 1.0 / (hidden_size ** 0.5)
    w6 = jax.random.uniform(kw, (hidden_size, output_size), jnp.float32, -bound, bound)
    b6 = jax.random.uniform(kb, (1, output_size), jnp.float32, -bound, bound)
    w6p = jnp.zeros((hidden_size, out_pad), jnp.float32).at[:, :output_size].set(w6)
    b6p = jnp.zeros((1, out_pad), jnp.float32).at[:, :output_size].set(b6)
    params += [w6p.astype(jnp.bfloat16), b6p]
    return params


def _reference_forward(x, params, output_size):
    """Pure-JAX f32 reference with identical (PyTorch train-mode) semantics."""
    h = x
    for layer in range(5):
        w, g, beta = params[3 * layer : 3 * layer + 3]
        z = h @ w.astype(jnp.float32)
        mean = jnp.mean(z, axis=0, keepdims=True)
        var = jnp.mean((z - mean) ** 2, axis=0, keepdims=True)
        h = jnp.maximum((z - mean) * jax.lax.rsqrt(var + BN_EPS) * g + beta, 0.0)
    w6, b6 = params[15], params[16]
    logits = h @ w6.astype(jnp.float32) + b6
    return jax.nn.sigmoid(logits)[:, :output_size]


if __name__ == "__main__":
    # The module's own formula gives hidden = int(400000 / (2*(in+out)) * 0.2).
    input_size = 256
    output_size = 56
    branching_alpha = 2
    samples_size = 400000
    hidden_size = int(samples_size / (branching_alpha * (input_size + output_size)) * 0.2)
    print("Hidden size: ", hidden_size)  # 128, mirrors the PyTorch __init__ print

    out_pad = max(LANE, ((output_size + LANE - 1) // LANE) * LANE)

    batch = 8
    key = jax.random.PRNGKey(0)
    key, kx = jax.random.split(key)
    x = jax.random.normal(kx, (batch, input_size), jnp.float32)

    params = make_params(key, input_size, hidden_size, output_size, out_pad)

    out = regressorv2_forward(x, params, output_size)
    out = jax.block_until_ready(out)

    assert out.shape == (batch, output_size)
    assert bool(jnp.all(jnp.isfinite(out)))
    assert bool(jnp.all((out >= 0.0) & (out <= 1.0)))  # sigmoid range

    ref = _reference_forward(x, params, output_size)
    max_err = float(jnp.max(jnp.abs(out - ref)))
    assert max_err < 5e-2, f"mismatch vs reference: {max_err}"

    print("KERNEL_OK")
</pallas_src>

<mosaic_0001>
module attributes {stable_mosaic.version = 11 : i64} {
  func.func @_regressorv2_kernel(%arg0: i32, %arg1: memref<8x256xf32, #tpu.memory_space<vmem>>, %arg2: memref<256x128xbf16, #tpu.memory_space<vmem>>, %arg3: memref<1x128xf32, #tpu.memory_space<vmem>>, %arg4: memref<1x128xf32, #tpu.memory_space<vmem>>, %arg5: memref<128x128xbf16, #tpu.memory_space<vmem>>, %arg6: memref<1x128xf32, #tpu.memory_space<vmem>>, %arg7: memref<1x128xf32, #tpu.memory_space<vmem>>, %arg8: memref<128x128xbf16, #tpu.memory_space<vmem>>, %arg9: memref<1x128xf32, #tpu.memory_space<vmem>>, %arg10: memref<1x128xf32, #tpu.memory_space<vmem>>, %arg11: memref<128x128xbf16, #tpu.memory_space<vmem>>, %arg12: memref<1x128xf32, #tpu.memory_space<vmem>>, %arg13: memref<1x128xf32, #tpu.memory_space<vmem>>, %arg14: memref<128x128xbf16, #tpu.memory_space<vmem>>, %arg15: memref<1x128xf32, #tpu.memory_space<vmem>>, %arg16: memref<1x128xf32, #tpu.memory_space<vmem>>, %arg17: memref<128x128xbf16, #tpu.memory_space<vmem>>, %arg18: memref<1x128xf32, #tpu.memory_space<vmem>>, %arg19: memref<8x128xf32, #tpu.memory_space<vmem>>) attributes {dimension_semantics = [#tpu.dimension_semantics<parallel>], iteration_bounds = array<i64: 1>, scalar_prefetch = 0 : i64, scratch_operands = 0 : i64, tpu.core_type = #tpu.core_type<tc>, window_params = [{transform_indices = @transform_0, window_bounds = array<i64: 8, 256>}, {pipeline_mode = #tpu.pipeline_mode<synchronous>, transform_indices = @transform_1, window_bounds = array<i64: 256, 128>}, {pipeline_mode = #tpu.pipeline_mode<synchronous>, transform_indices = @transform_2, window_bounds = array<i64: 1, 128>}, {pipeline_mode = #tpu.pipeline_mode<synchronous>, transform_indices = @transform_3, window_bounds = array<i64: 1, 128>}, {pipeline_mode = #tpu.pipeline_mode<synchronous>, transform_indices = @transform_4, window_bounds = array<i64: 128, 128>}, {pipeline_mode = #tpu.pipeline_mode<synchronous>, transform_indices = @transform_5, window_bounds = array<i64: 1, 128>}, {pipeline_mode = #tpu.pipeline_mode<synchronous>, transform_indices = @transform_6, window_bounds = array<i64: 1, 128>}, {pipeline_mode = #tpu.pipeline_mode<synchronous>, transform_indices = @transform_7, window_bounds = array<i64: 128, 128>}, {pipeline_mode = #tpu.pipeline_mode<synchronous>, transform_indices = @transform_8, window_bounds = array<i64: 1, 128>}, {pipeline_mode = #tpu.pipeline_mode<synchronous>, transform_indices = @transform_9, window_bounds = array<i64: 1, 128>}, {pipeline_mode = #tpu.pipeline_mode<synchronous>, transform_indices = @transform_10, window_bounds = array<i64: 128, 128>}, {pipeline_mode = #tpu.pipeline_mode<synchronous>, transform_indices = @transform_11, window_bounds = array<i64: 1, 128>}, {pipeline_mode = #tpu.pipeline_mode<synchronous>, transform_indices = @transform_12, window_bounds = array<i64: 1, 128>}, {pipeline_mode = #tpu.pipeline_mode<synchronous>, transform_indices = @transform_13, window_bounds = array<i64: 128, 128>}, {pipeline_mode = #tpu.pipeline_mode<synchronous>, transform_indices = @transform_14, window_bounds = array<i64: 1, 128>}, {pipeline_mode = #tpu.pipeline_mode<synchronous>, transform_indices = @transform_15, window_bounds = array<i64: 1, 128>}, {pipeline_mode = #tpu.pipeline_mode<synchronous>, transform_indices = @transform_16, window_bounds = array<i64: 128, 128>}, {pipeline_mode = #tpu.pipeline_mode<synchronous>, transform_indices = @transform_17, window_bounds = array<i64: 1, 128>}, {transform_indices = @transform_18, window_bounds = array<i64: 8, 128>}]} {
    %c0 = arith.constant 0 : index
    %c0_0 = arith.constant 0 : index
    %0 = vector.load %arg1[%c0, %c0_0] : memref<8x256xf32, #tpu.memory_space<vmem>>, vector<8x256xf32>
    %1 = arith.truncf %0 : vector<8x256xf32> to vector<8x256xbf16>
    %c0_1 = arith.constant 0 : index
    %c0_2 = arith.constant 0 : index
    %2 = vector.load %arg2[%c0_1, %c0_2] : memref<256x128xbf16, #tpu.memory_space<vmem>>, vector<256x128xbf16>
    %cst = arith.constant dense<0.000000e+00> : vector<8x128xf32>
    %3 = tpu.matmul %1, %2, %cst {dimension_numbers = #tpu.dot_dimension_numbers<[1], [0], [0], [1], [0, 0, 1, 1], [], []>} : vector<8x256xbf16>, vector<256x128xbf16>, vector<8x128xf32> -> vector<8x128xf32>
    %cst_3 = arith.constant dense<0.000000e+00> : vector<128xf32>
    %4 = vector.multi_reduction <add>, %3, %cst_3 [0] : vector<8x128xf32> to vector<128xf32>
    %5 = vector.shape_cast %4 : vector<128xf32> to vector<1x128xf32>
    %cst_4 = arith.constant 1.250000e-01 : f32
    %6 = vector.broadcast %cst_4 : f32 to vector<1x128xf32>
    %7 = arith.mulf %5, %6 : vector<1x128xf32>
    %8 = arith.mulf %3, %3 : vector<8x128xf32>
    %cst_5 = arith.constant dense<0.000000e+00> : vector<128xf32>
    %9 = vector.multi_reduction <add>, %8, %cst_5 [0] : vector<8x128xf32> to vector<128xf32>
    %10 = vector.shape_cast %9 : vector<128xf32> to vector<1x128xf32>
    %cst_6 = arith.constant 1.250000e-01 : f32
    %11 = vector.broadcast %cst_6 : f32 to vector<1x128xf32>
    %12 = arith.mulf %10, %11 : vector<1x128xf32>
    %13 = arith.mulf %7, %7 : vector<1x128xf32>
    %14 = arith.subf %12, %13 : vector<1x128xf32>
    %cst_7 = arith.constant 0.000000e+00 : f32
    %15 = vector.broadcast %cst_7 : f32 to vector<1x128xf32>
    %16 = arith.maximumf %14, %15 : vector<1x128xf32>
    %c0_8 = arith.constant 0 : index
    %c0_9 = arith.constant 0 : index
    %17 = vector.load %arg3[%c0_8, %c0_9] : memref<1x128xf32, #tpu.memory_space<vmem>>, vector<1x128xf32>
    %cst_10 = arith.constant 9.99999974E-6 : f32
    %18 = vector.broadcast %cst_10 : f32 to vector<1x128xf32>
    %19 = arith.addf %16, %18 : vector<1x128xf32>
    %20 = math.rsqrt %19 : vector<1x128xf32>
    %21 = arith.mulf %17, %20 : vector<1x128xf32>
    %c0_11 = arith.constant 0 : index
    %c0_12 = arith.constant 0 : index
    %22 = vector.load %arg4[%c0_11, %c0_12] : memref<1x128xf32, #tpu.memory_space<vmem>>, vector<1x128xf32>
    %23 = arith.mulf %7, %21 : vector<1x128xf32>
    %24 = arith.subf %22, %23 : vector<1x128xf32>
    %25 = vector.broadcast %21 : vector<1x128xf32> to vector<8x128xf32>
    %26 = arith.mulf %3, %25 : vector<8x128xf32>
    %27 = vector.broadcast %24 : vector<1x128xf32> to vector<8x128xf32>
    %28 = arith.addf %26, %27 : vector<8x128xf32>
    %cst_13 = arith.constant 0.000000e+00 : f32
    %29 = vector.broadcast %cst_13 : f32 to vector<8x128xf32>
    %30 = arith.maximumf %28, %29 : vector<8x128xf32>
    %31 = arith.truncf %30 : vector<8x128xf32> to vector<8x128xbf16>
    %c0_14 = arith.constant 0 : index
    %c0_15 = arith.constant 0 : index
    %32 = vector.load %arg5[%c0_14, %c0_15] : memref<128x128xbf16, #tpu.memory_space<vmem>>, vector<128x128xbf16>
    %cst_16 = arith.constant dense<0.000000e+00> : vector<8x128xf32>
    %33 = tpu.matmul %31, %32, %cst_16 {dimension_numbers = #tpu.dot_dimension_numbers<[1], [0], [0], [1], [0, 0, 1, 1], [], []>} : vector<8x128xbf16>, vector<128x128xbf16>, vector<8x128xf32> -> vector<8x128xf32>
    %cst_17 = arith.constant dense<0.000000e+00> : vector<128xf32>
    %34 = vector.multi_reduction <add>, %33, %cst_17 [0] : vector<8x128xf32> to vector<128xf32>
    %35 = vector.shape_cast %34 : vector<128xf32> to vector<1x128xf32>
    %cst_18 = arith.constant 1.250000e-01 : f32
    %36 = vector.broadcast %cst_18 : f32 to vector<1x128xf32>
    %37 = arith.mulf %35, %36 : vector<1x128xf32>
    %38 = arith.mulf %33, %33 : vector<8x128xf32>
    %cst_19 = arith.constant dense<0.000000e+00> : vector<128xf32>
    %39 = vector.multi_reduction <add>, %38, %cst_19 [0] : vector<8x128xf32> to vector<128xf32>
    %40 = vector.shape_cast %39 : vector<128xf32> to vector<1x128xf32>
    %cst_20 = arith.constant 1.250000e-01 : f32
    %41 = vector.broadcast %cst_20 : f32 to vector<1x128xf32>
    %42 = arith.mulf %40, %41 : vector<1x128xf32>
    %43 = arith.mulf %37, %37 : vector<1x128xf32>
    %44 = arith.subf %42, %43 : vector<1x128xf32>
    %cst_21 = arith.constant 0.000000e+00 : f32
    %45 = vector.broadcast %cst_21 : f32 to vector<1x128xf32>
    %46 = arith.maximumf %44, %45 : vector<1x128xf32>
    %c0_22 = arith.constant 0 : index
    %c0_23 = arith.constant 0 : index
    %47 = vector.load %arg6[%c0_22, %c0_23] : memref<1x128xf32, #tpu.memory_space<vmem>>, vector<1x128xf32>
    %cst_24 = arith.constant 9.99999974E-6 : f32
    %48 = vector.broadcast %cst_24 : f32 to vector<1x128xf32>
    %49 = arith.addf %46, %48 : vector<1x128xf32>
    %50 = math.rsqrt %49 : vector<1x128xf32>
    %51 = arith.mulf %47, %50 : vector<1x128xf32>
    %c0_25 = arith.constant 0 : index
    %c0_26 = arith.constant 0 : index
    %52 = vector.load %arg7[%c0_25, %c0_26] : memref<1x128xf32, #tpu.memory_space<vmem>>, vector<1x128xf32>
    %53 = arith.mulf %37, %51 : vector<1x128xf32>
    %54 = arith.subf %52, %53 : vector<1x128xf32>
    %55 = vector.broadcast %51 : vector<1x128xf32> to vector<8x128xf32>
    %56 = arith.mulf %33, %55 : vector<8x128xf32>
    %57 = vector.broadcast %54 : vector<1x128xf32> to vector<8x128xf32>
    %58 = arith.addf %56, %57 : vector<8x128xf32>
    %cst_27 = arith.constant 0.000000e+00 : f32
    %59 = vector.broadcast %cst_27 : f32 to vector<8x128xf32>
    %60 = arith.maximumf %58, %59 : vector<8x128xf32>
    %61 = arith.truncf %60 : vector<8x128xf32> to vector<8x128xbf16>
    %c0_28 = arith.constant 0 : index
    %c0_29 = arith.constant 0 : index
    %62 = vector.load %arg8[%c0_28, %c0_29] : memref<128x128xbf16, #tpu.memory_space<vmem>>, vector<128x128xbf16>
    %cst_30 = arith.constant dense<0.000000e+00> : vector<8x128xf32>
    %63 = tpu.matmul %61, %62, %cst_30 {dimension_numbers = #tpu.dot_dimension_numbers<[1], [0], [0], [1], [0, 0, 1, 1], [], []>} : vector<8x128xbf16>, vector<128x128xbf16>, vector<8x128xf32> -> vector<8x128xf32>
    %cst_31 = arith.constant dense<0.000000e+00> : vector<128xf32>
    %64 = vector.multi_reduction <add>, %63, %cst_31 [0] : vector<8x128xf32> to vector<128xf32>
    %65 = vector.shape_cast %64 : vector<128xf32> to vector<1x128xf32>
    %cst_32 = arith.constant 1.250000e-01 : f32
    %66 = vector.broadcast %cst_32 : f32 to vector<1x128xf32>
    %67 = arith.mulf %65, %66 : vector<1x128xf32>
    %68 = arith.mulf %63, %63 : vector<8x128xf32>
    %cst_33 = arith.constant dense<0.000000e+00> : vector<128xf32>
    %69 = vector.multi_reduction <add>, %68, %cst_33 [0] : vector<8x128xf32> to vector<128xf32>
    %70 = vector.shape_cast %69 : vector<128xf32> to vector<1x128xf32>
    %cst_34 = arith.constant 1.250000e-01 : f32
    %71 = vector.broadcast %cst_34 : f32 to vector<1x128xf32>
    %72 = arith.mulf %70, %71 : vector<1x128xf32>
    %73 = arith.mulf %67, %67 : vector<1x128xf32>
    %74 = arith.subf %72, %73 : vector<1x128xf32>
    %cst_35 = arith.constant 0.000000e+00 : f32
    %75 = vector.broadcast %cst_35 : f32 to vector<1x128xf32>
    %76 = arith.maximumf %74, %75 : vector<1x128xf32>
    %c0_36 = arith.constant 0 : index
    %c0_37 = arith.constant 0 : index
    %77 = vector.load %arg9[%c0_36, %c0_37] : memref<1x128xf32, #tpu.memory_space<vmem>>, vector<1x128xf32>
    %cst_38 = arith.constant 9.99999974E-6 : f32
    %78 = vector.broadcast %cst_38 : f32 to vector<1x128xf32>
    %79 = arith.addf %76, %78 : vector<1x128xf32>
    %80 = math.rsqrt %79 : vector<1x128xf32>
    %81 = arith.mulf %77, %80 : vector<1x128xf32>
    %c0_39 = arith.constant 0 : index
    %c0_40 = arith.constant 0 : index
    %82 = vector.load %arg10[%c0_39, %c0_40] : memref<1x128xf32, #tpu.memory_space<vmem>>, vector<1x128xf32>
    %83 = arith.mulf %67, %81 : vector<1x128xf32>
    %84 = arith.subf %82, %83 : vector<1x128xf32>
    %85 = vector.broadcast %81 : vector<1x128xf32> to vector<8x128xf32>
    %86 = arith.mulf %63, %85 : vector<8x128xf32>
    %87 = vector.broadcast %84 : vector<1x128xf32> to vector<8x128xf32>
    %88 = arith.addf %86, %87 : vector<8x128xf32>
    %cst_41 = arith.constant 0.000000e+00 : f32
    %89 = vector.broadcast %cst_41 : f32 to vector<8x128xf32>
    %90 = arith.maximumf %88, %89 : vector<8x128xf32>
    %91 = arith.truncf %90 : vector<8x128xf32> to vector<8x128xbf16>
    %c0_42 = arith.constant 0 : index
    %c0_43 = arith.constant 0 : index
    %92 = vector.load %arg11[%c0_42, %c0_43] : memref<128x128xbf16, #tpu.memory_space<vmem>>, vector<128x128xbf16>
    %cst_44 = arith.constant dense<0.000000e+00> : vector<8x128xf32>
    %93 = tpu.matmul %91, %92, %cst_44 {dimension_numbers = #tpu.dot_dimension_numbers<[1], [0], [0], [1], [0, 0, 1, 1], [], []>} : vector<8x128xbf16>, vector<128x128xbf16>, vector<8x128xf32> -> vector<8x128xf32>
    %cst_45 = arith.constant dense<0.000000e+00> : vector<128xf32>
    %94 = vector.multi_reduction <add>, %93, %cst_45 [0] : vector<8x128xf32> to vector<128xf32>
    %95 = vector.shape_cast %94 : vector<128xf32> to vector<1x128xf32>
    %cst_46 = arith.constant 1.250000e-01 : f32
    %96 = vector.broadcast %cst_46 : f32 to vector<1x128xf32>
    %97 = arith.mulf %95, %96 : vector<1x128xf32>
    %98 = arith.mulf %93, %93 : vector<8x128xf32>
    %cst_47 = arith.constant dense<0.000000e+00> : vector<128xf32>
    %99 = vector.multi_reduction <add>, %98, %cst_47 [0] : vector<8x128xf32> to vector<128xf32>
    %100 = vector.shape_cast %99 : vector<128xf32> to vector<1x128xf32>
    %cst_48 = arith.constant 1.250000e-01 : f32
    %101 = vector.broadcast %cst_48 : f32 to vector<1x128xf32>
    %102 = arith.mulf %100, %101 : vector<1x128xf32>
    %103 = arith.mulf %97, %97 : vector<1x128xf32>
    %104 = arith.subf %102, %103 : vector<1x128xf32>
    %cst_49 = arith.constant 0.000000e+00 : f32
    %105 = vector.broadcast %cst_49 : f32 to vector<1x128xf32>
    %106 = arith.maximumf %104, %105 : vector<1x128xf32>
    %c0_50 = arith.constant 0 : index
    %c0_51 = arith.constant 0 : index
    %107 = vector.load %arg12[%c0_50, %c0_51] : memref<1x128xf32, #tpu.memory_space<vmem>>, vector<1x128xf32>
    %cst_52 = arith.constant 9.99999974E-6 : f32
    %108 = vector.broadcast %cst_52 : f32 to vector<1x128xf32>
    %109 = arith.addf %106, %108 : vector<1x128xf32>
    %110 = math.rsqrt %109 : vector<1x128xf32>
    %111 = arith.mulf %107, %110 : vector<1x128xf32>
    %c0_53 = arith.constant 0 : index
    %c0_54 = arith.constant 0 : index
    %112 = vector.load %arg13[%c0_53, %c0_54] : memref<1x128xf32, #tpu.memory_space<vmem>>, vector<1x128xf32>
    %113 = arith.mulf %97, %111 : vector<1x128xf32>
    %114 = arith.subf %112, %113 : vector<1x128xf32>
    %115 = vector.broadcast %111 : vector<1x128xf32> to vector<8x128xf32>
    %116 = arith.mulf %93, %115 : vector<8x128xf32>
    %117 = vector.broadcast %114 : vector<1x128xf32> to vector<8x128xf32>
    %118 = arith.addf %116, %117 : vector<8x128xf32>
    %cst_55 = arith.constant 0.000000e+00 : f32
    %119 = vector.broadcast %cst_55 : f32 to vector<8x128xf32>
    %120 = arith.maximumf %118, %119 : vector<8x128xf32>
    %121 = arith.truncf %120 : vector<8x128xf32> to vector<8x128xbf16>
    %c0_56 = arith.constant 0 : index
    %c0_57 = arith.constant 0 : index
    %122 = vector.load %arg14[%c0_56, %c0_57] : memref<128x128xbf16, #tpu.memory_space<vmem>>, vector<128x128xbf16>
    %cst_58 = arith.constant dense<0.000000e+00> : vector<8x128xf32>
    %123 = tpu.matmul %121, %122, %cst_58 {dimension_numbers = #tpu.dot_dimension_numbers<[1], [0], [0], [1], [0, 0, 1, 1], [], []>} : vector<8x128xbf16>, vector<128x128xbf16>, vector<8x128xf32> -> vector<8x128xf32>
    %cst_59 = arith.constant dense<0.000000e+00> : vector<128xf32>
    %124 = vector.multi_reduction <add>, %123, %cst_59 [0] : vector<8x128xf32> to vector<128xf32>
    %125 = vector.shape_cast %124 : vector<128xf32> to vector<1x128xf32>
    %cst_60 = arith.constant 1.250000e-01 : f32
    %126 = vector.broadcast %cst_60 : f32 to vector<1x128xf32>
    %127 = arith.mulf %125, %126 : vector<1x128xf32>
    %128 = arith.mulf %123, %123 : vector<8x128xf32>
    %cst_61 = arith.constant dense<0.000000e+00> : vector<128xf32>
    %129 = vector.multi_reduction <add>, %128, %cst_61 [0] : vector<8x128xf32> to vector<128xf32>
    %130 = vector.shape_cast %129 : vector<128xf32> to vector<1x128xf32>
    %cst_62 = arith.constant 1.250000e-01 : f32
    %131 = vector.broadcast %cst_62 : f32 to vector<1x128xf32>
    %132 = arith.mulf %130, %131 : vector<1x128xf32>
    %133 = arith.mulf %127, %127 : vector<1x128xf32>
    %134 = arith.subf %132, %133 : vector<1x128xf32>
    %cst_63 = arith.constant 0.000000e+00 : f32
    %135 = vector.broadcast %cst_63 : f32 to vector<1x128xf32>
    %136 = arith.maximumf %134, %135 : vector<1x128xf32>
    %c0_64 = arith.constant 0 : index
    %c0_65 = arith.constant 0 : index
    %137 = vector.load %arg15[%c0_64, %c0_65] : memref<1x128xf32, #tpu.memory_space<vmem>>, vector<1x128xf32>
    %cst_66 = arith.constant 9.99999974E-6 : f32
    %138 = vector.broadcast %cst_66 : f32 to vector<1x128xf32>
    %139 = arith.addf %136, %138 : vector<1x128xf32>
    %140 = math.rsqrt %139 : vector<1x128xf32>
    %141 = arith.mulf %137, %140 : vector<1x128xf32>
    %c0_67 = arith.constant 0 : index
    %c0_68 = arith.constant 0 : index
    %142 = vector.load %arg16[%c0_67, %c0_68] : memref<1x128xf32, #tpu.memory_space<vmem>>, vector<1x128xf32>
    %143 = arith.mulf %127, %141 : vector<1x128xf32>
    %144 = arith.subf %142, %143 : vector<1x128xf32>
    %145 = vector.broadcast %141 : vector<1x128xf32> to vector<8x128xf32>
    %146 = arith.mulf %123, %145 : vector<8x128xf32>
    %147 = vector.broadcast %144 : vector<1x128xf32> to vector<8x128xf32>
    %148 = arith.addf %146, %147 : vector<8x128xf32>
    %cst_69 = arith.constant 0.000000e+00 : f32
    %149 = vector.broadcast %cst_69 : f32 to vector<8x128xf32>
    %150 = arith.maximumf %148, %149 : vector<8x128xf32>
    %151 = arith.truncf %150 : vector<8x128xf32> to vector<8x128xbf16>
    %c0_70 = arith.constant 0 : index
    %c0_71 = arith.constant 0 : index
    %152 = vector.load %arg17[%c0_70, %c0_71] : memref<128x128xbf16, #tpu.memory_space<vmem>>, vector<128x128xbf16>
    %cst_72 = arith.constant dense<0.000000e+00> : vector<8x128xf32>
    %153 = tpu.matmul %151, %152, %cst_72 {dimension_numbers = #tpu.dot_dimension_numbers<[1], [0], [0], [1], [0, 0, 1, 1], [], []>} : vector<8x128xbf16>, vector<128x128xbf16>, vector<8x128xf32> -> vector<8x128xf32>
    %c0_73 = arith.constant 0 : index
    %c0_74 = arith.constant 0 : index
    %154 = vector.load %arg18[%c0_73, %c0_74] : memref<1x128xf32, #tpu.memory_space<vmem>>, vector<1x128xf32>
    %155 = vector.broadcast %154 : vector<1x128xf32> to vector<8x128xf32>
    %156 = arith.addf %153, %155 : vector<8x128xf32>
    %157 = arith.negf %156 : vector<8x128xf32>
    %158 = math.exp %157 : vector<8x128xf32>
    %cst_75 = arith.constant 1.000000e+00 : f32
    %159 = vector.broadcast %cst_75 : f32 to vector<8x128xf32>
    %160 = arith.addf %159, %158 : vector<8x128xf32>
    %161 = arith.divf %159, %160 : vector<8x128xf32>
    %c0_76 = arith.constant 0 : index
    %c0_77 = arith.constant 0 : index
    %162 = vector.load %arg19[%c0_76, %c0_77] : memref<8x128xf32, #tpu.memory_space<vmem>>, vector<8x128xf32>
    tpu.vector_store %arg19[%c0_76, %c0_77], %161 {strides = array<i32>} : memref<8x128xf32, #tpu.memory_space<vmem>>, vector<8x128xf32>,
    return
  }
  func.func @transform_0(%arg0: i32) -> (i32, i32) {
    %c0_i32 = arith.constant 0 : i32
    %c0_i32_0 = arith.constant 0 : i32
    return %arg0, %c0_i32 : i32, i32
  }
  func.func @transform_1(%arg0: i32) -> (i32, i32) {
    %c0_i32 = arith.constant 0 : i32
    %c0_i32_0 = arith.constant 0 : i32
    %c0_i32_1 = arith.constant 0 : i32
    return %c0_i32, %c0_i32_0 : i32, i32
  }
  func.func @transform_2(%arg0: i32) -> (i32, i32) {
    %c0_i32 = arith.constant 0 : i32
    %c0_i32_0 = arith.constant 0 : i32
    %c0_i32_1 = arith.constant 0 : i32
    return %c0_i32, %c0_i32_0 : i32, i32
  }
  func.func @transform_3(%arg0: i32) -> (i32, i32) {
    %c0_i32 = arith.constant 0 : i32
    %c0_i32_0 = arith.constant 0 : i32
    %c0_i32_1 = arith.constant 0 : i32
    return %c0_i32, %c0_i32_0 : i32, i32
  }
  func.func @transform_4(%arg0: i32) -> (i32, i32) {
    %c0_i32 = arith.constant 0 : i32
    %c0_i32_0 = arith.constant 0 : i32
    %c0_i32_1 = arith.constant 0 : i32
    return %c0_i32, %c0_i32_0 : i32, i32
  }
  func.func @transform_5(%arg0: i32) -> (i32, i32) {
    %c0_i32 = arith.constant 0 : i32
    %c0_i32_0 = arith.constant 0 : i32
    %c0_i32_1 = arith.constant 0 : i32
    return %c0_i32, %c0_i32_0 : i32, i32
  }
  func.func @transform_6(%arg0: i32) -> (i32, i32) {
    %c0_i32 = arith.constant 0 : i32
    %c0_i32_0 = arith.constant 0 : i32
    %c0_i32_1 = arith.constant 0 : i32
    return %c0_i32, %c0_i32_0 : i32, i32
  }
  func.func @transform_7(%arg0: i32) -> (i32, i32) {
    %c0_i32 = arith.constant 0 : i32
    %c0_i32_0 = arith.constant 0 : i32
    %c0_i32_1 = arith.constant 0 : i32
    return %c0_i32, %c0_i32_0 : i32, i32
  }
  func.func @transform_8(%arg0: i32) -> (i32, i32) {
    %c0_i32 = arith.constant 0 : i32
    %c0_i32_0 = arith.constant 0 : i32
    %c0_i32_1 = arith.constant 0 : i32
    return %c0_i32, %c0_i32_0 : i32, i32
  }
  func.func @transform_9(%arg0: i32) -> (i32, i32) {
    %c0_i32 = arith.constant 0 : i32
    %c0_i32_0 = arith.constant 0 : i32
    %c0_i32_1 = arith.constant 0 : i32
    return %c0_i32, %c0_i32_0 : i32, i32
  }
  func.func @transform_10(%arg0: i32) -> (i32, i32) {
    %c0_i32 = arith.constant 0 : i32
    %c0_i32_0 = arith.constant 0 : i32
    %c0_i32_1 = arith.constant 0 : i32
    return %c0_i32, %c0_i32_0 : i32, i32
  }
  func.func @transform_11(%arg0: i32) -> (i32, i32) {
    %c0_i32 = arith.constant 0 : i32
    %c0_i32_0 = arith.constant 0 : i32
    %c0_i32_1 = arith.constant 0 : i32
    return %c0_i32, %c0_i32_0 : i32, i32
  }
  func.func @transform_12(%arg0: i32) -> (i32, i32) {
    %c0_i32 = arith.constant 0 : i32
    %c0_i32_0 = arith.constant 0 : i32
    %c0_i32_1 = arith.constant 0 : i32
    return %c0_i32, %c0_i32_0 : i32, i32
  }
  func.func @transform_13(%arg0: i32) -> (i32, i32) {
    %c0_i32 = arith.constant 0 : i32
    %c0_i32_0 = arith.constant 0 : i32
    %c0_i32_1 = arith.constant 0 : i32
    return %c0_i32, %c0_i32_0 : i32, i32
  }
  func.func @transform_14(%arg0: i32) -> (i32, i32) {
    %c0_i32 = arith.constant 0 : i32
    %c0_i32_0 = arith.constant 0 : i32
    %c0_i32_1 = arith.constant 0 : i32
    return %c0_i32, %c0_i32_0 : i32, i32
  }
  func.func @transform_15(%arg0: i32) -> (i32, i32) {
    %c0_i32 = arith.constant 0 : i32
    %c0_i32_0 = arith.constant 0 : i32
    %c0_i32_1 = arith.constant 0 : i32
    return %c0_i32, %c0_i32_0 : i32, i32
  }
  func.func @transform_16(%arg0: i32) -> (i32, i32) {
    %c0_i32 = arith.constant 0 : i32
    %c0_i32_0 = arith.constant 0 : i32
    %c0_i32_1 = arith.constant 0 : i32
    return %c0_i32, %c0_i32_0 : i32, i32
  }
  func.func @transform_17(%arg0: i32) -> (i32, i32) {
    %c0_i32 = arith.constant 0 : i32
    %c0_i32_0 = arith.constant 0 : i32
    %c0_i32_1 = arith.constant 0 : i32
    return %c0_i32, %c0_i32_0 : i32, i32
  }
  func.func @transform_18(%arg0: i32) -> (i32, i32) {
    %c0_i32 = arith.constant 0 : i32
    %c0_i32_0 = arith.constant 0 : i32
    return %arg0, %c0_i32 : i32, i32
  }
}

</mosaic_0001>

<bundles_post_ra>
// kernel: tpu_custom_call.1
= control target key start
LH: loop header
LB: loop body
LE: loop exit
PB: predicated region body
PF: predicated region fallthrough
CT: control target
= control target key end

     0   :  { %s1662_s0 = inlined_call_operand.hbm [shape: f32[8,256], index: 0, kind: input, shape index: {}]   ;;  %s1663_s1 = inlined_call_operand.hbm [shape: bf16[256,128], index: 1, kind: input, shape index: {}]   ;;  %s1664_s2 = inlined_call_operand.vmem [shape: f32[1,128], index: 2, kind: input, shape index: {}]   ;;  %s1665_s3 = inlined_call_operand.vmem [shape: f32[1,128], index: 3, kind: input, shape index: {}]   ;;  %s1666_s4 = inlined_call_operand.hbm [shape: bf16[128,128], index: 4, kind: input, shape index: {}]   ;;  %s1667_s5 = inlined_call_operand.vmem [shape: f32[1,128], index: 5, kind: input, shape index: {}]   ;;  %s1668_s6 = inlined_call_operand.vmem [shape: f32[1,128], index: 6, kind: input, shape index: {}]   ;;  %s1669_s7 = inlined_call_operand.hbm [shape: bf16[128,128], index: 7, kind: input, shape index: {}]   ;;  %s1670_s8 = inlined_call_operand.vmem [shape: f32[1,128], index: 8, kind: input, shape index: {}]   ;;  %s1671_s9 = inlined_call_operand.vmem [shape: f32[1,128], index: 9, kind: input, shape index: {}]   ;;  %s1672_s10 = inlined_call_operand.hbm [shape: bf16[128,128], index: 10, kind: input, shape index: {}]   ;;  %s1673_s11 = inlined_call_operand.vmem [shape: f32[1,128], index: 11, kind: input, shape index: {}]   ;;  %s1674_s12 = inlined_call_operand.vmem [shape: f32[1,128], index: 12, kind: input, shape index: {}]   ;;  %s1675_s13 = inlined_call_operand.hbm [shape: bf16[128,128], index: 13, kind: input, shape index: {}]   ;;  %s1676_s14 = inlined_call_operand.vmem [shape: f32[1,128], index: 14, kind: input, shape index: {}]   ;;  %s1677_s15 = inlined_call_operand.vmem [shape: f32[1,128], index: 15, kind: input, shape index: {}]   ;;  %s1678_s16 = inlined_call_operand.hbm [shape: bf16[128,128], index: 16, kind: input, shape index: {}]   ;;  %s1679_s17 = inlined_call_operand.vmem [shape: f32[1,128], index: 17, kind: input, shape index: {}]   ;;  %s1680_s18 = inlined_call_operand.hbm [shape: f32[8,128], index: 18, kind: output, shape index: {}]  }
   0x1   :  { %1681 = sst [smem:[#allocation20_spill]] %s1662_s0 }
   0x2   :  { %1682 = sst [smem:[#allocation21_spill]] %s1663_s1 }
   0x3   :  { %1683 = sst [smem:[#allocation22_spill]] %s1664_s2 }
   0x4   :  { %23 = vsyncpa [#allocation3], 0 }
   0x5   :  { %24 = vsyncpa [#allocation6], 0 }
   0x6   :  { %25 = vsyncpa [#allocation9], 0 }
   0x7   :  { %26 = vsyncpa [#allocation12], 0  ;;  %s1684_s29 = sld [smem:[#allocation21_spill]] }
   0xd   :  { %s43_s30 = sshll.u32 %s1684_s29, 4  ;;  %s44_s30 = int_to_ptr.hbm [resolvable:$true] %s43_s30 }
   0xe   :  { %27 = vsyncpa [#allocation4], 0  ;;  %s1482_s0 = smov [#allocation5]   ;;  %s77_s21 = sshll.u32 %s1669_s7, 4  ;;  %s78_s21 = int_to_ptr.hbm [resolvable:$true] %s77_s21 }
   0xf   :  { %s45_s19 = sshll.u32 %s1482_s0, 4  ;;  %s1483_s22 = smov 64   ;;  %s46_s19 = int_to_ptr.vmem [resolvable:$true] %s45_s19 }
  0x10   :  { %s1484_s2 = smov 4   ;;  %s1485_s23 = smov [#allocation8]  }
  0x11   :  { %51 = dma.hbm_to_vmem [thread:$0]  %s44_s30, 2048, %s46_s19, [#allocation6], %s1483_s22, %s1483_s22, %s1484_s2  }
  0x12   :  { %s79_s24 = sshll.u32 %s1485_s23, 4  ;;  %s111_s27 = sshll.u32 %s1675_s13, 4  ;;  %s80_s24 = int_to_ptr.vmem [resolvable:$true] %s79_s24  ;;  %s112_s27 = int_to_ptr.hbm [resolvable:$true] %s111_s27 }
  0x13   :  { %85 = dma.hbm_to_vmem [thread:$0]  %s78_s21, 1024, %s80_s24, [#allocation9], %s1483_s22, %s1483_s22, %s1484_s2  }
  0x14   :  { %s1685_s29 = sld [smem:[#allocation20_spill]]  ;;  %s1486_s1 = smov [#allocation11]  }
  0x15   :  { %s113_s20 = sshll.u32 %s1486_s1, 4  ;;  %s1487_s30 = smov [#allocation2]   ;;  %s114_s20 = int_to_ptr.vmem [resolvable:$true] %s113_s20 }
  0x16   :  { %119 = dma.hbm_to_vmem [thread:$0]  %s112_s27, 1024, %s114_s20, [#allocation12], %s1483_s22, %s1483_s22, %s1484_s2  }
  0x17   :  { %s35_s13 = sshll.u32 %s1487_s30, 4  ;;  %s60_s25 = sshll.u32 %s1666_s4, 4  ;;  %s36_s13 = int_to_ptr.vmem [resolvable:$true] %s35_s13  ;;  %s61_s25 = int_to_ptr.hbm [resolvable:$true] %s60_s25 }
  0x18   :  { %s94_s26 = sshll.u32 %s1672_s10, 4  ;;  %s1488_s7 = smov [#allocation7]   ;;  %s95_s26 = int_to_ptr.hbm [resolvable:$true] %s94_s26 }
  0x19   :  { %s62_s28 = sshll.u32 %s1488_s7, 4  ;;  %s1489_s27 = smov [#allocation10]   ;;  %s63_s28 = int_to_ptr.vmem [resolvable:$true] %s62_s28 }
  0x1a   :  { %s33_s0 = sshll.u32 %s1685_s29, 4  ;;  %s96_s29 = sshll.u32 %s1489_s27, 4  ;;  %s34_s0 = int_to_ptr.hbm [resolvable:$true] %s33_s0  ;;  %s97_s29 = int_to_ptr.vmem [resolvable:$true] %s96_s29 }
  0x1b   :  { %38 = dma.hbm_to_vmem [thread:$0]  %s34_s0, 256, %s36_s13, [#allocation3]  }
  0x1c   :  { %68 = dma.hbm_to_vmem [thread:$0]  %s61_s25, 1024, %s63_s28, [#allocation6], %s1483_s22, %s1483_s22, %s1484_s2  }
  0x1d   :  { %s128_s4 = sshll.u32 %s1678_s16, 4  ;;  %s1490_s10 = smov [#allocation13]   ;;  %s129_s4 = int_to_ptr.hbm [resolvable:$true] %s128_s4 }
  0x1e   :  { %102 = dma.hbm_to_vmem [thread:$0]  %s95_s26, 1024, %s97_s29, [#allocation9], %s1483_s22, %s1483_s22, %s1484_s2  }
  0x1f   :  { %s130_s0 = sshll.u32 %s1490_s10, 4  ;;  %s131_s0 = int_to_ptr.vmem [resolvable:$true] %s130_s0 }
  0x20   :  { %136 = dma.hbm_to_vmem [thread:$0]  %s129_s4, 1024, %s131_s0, [#allocation12], %s1483_s22, %s1483_s22, %s1484_s2  }
  0x21   :  { %1472 = dma.done.wait [#allocation3], 256  }
  0x22   :  { %1473 = vsyncadd [#allocation3], 4294967040 }
  0x23   :  { %1474 = dma.done.wait [#allocation6], 3072  }
  0x24   :  { %1475 = vsyncadd [#allocation6], 4294964224 }
  0x25   :  { %1476 = dma.done.wait [#allocation9], 2048  }
  0x26   :  { %1477 = vsyncadd [#allocation9], 4294965248 }
  0x27   :  { %1478 = dma.done.wait [#allocation12], 2048  }
  0x28   :  { %1479 = vsyncadd [#allocation12], 4294965248  ;;  %v1206_v0 = vld [vmem:[#allocation5 + $0x38] sm:$0xff]  ;;  %v1205_v2 = vld [vmem:[#allocation5 + $0x30] sm:$0xff]  ;;  %s1686_s2 = sld [smem:[#allocation22_spill]] }
  0x29   :  { %v1214_v1 = vld [vmem:[#allocation5 + $0x78] sm:$0xff]  ;;  %299 = vmatpush.bf16.msra.mxu0 %v1206_v0  ;;  %v1213_v3 = vld [vmem:[#allocation5 + $0x70] sm:$0xff]  ;;  %v1204_v4 = vld [vmem:[#allocation5 + $0x28] sm:$0xff] }
  0x2a   :  { %312 = vmatpush.bf16.msra.mxu1 %v1214_v1  ;;  %v1212_v5 = vld [vmem:[#allocation5 + $0x68] sm:$0xff]  ;;  %v1203_v6 = vld [vmem:[#allocation5 + $0x20] sm:$0xff]  ;;  %v1202_v8 = vld [vmem:[#allocation5 + $0x18] sm:$0xff] }
  0x2b   :  { %v1211_v7 = vld [vmem:[#allocation5 + $0x60] sm:$0xff]  ;;  %v1210_v9 = vld [vmem:[#allocation5 + $0x58] sm:$0xff]  ;;  %v1201_v10 = vld [vmem:[#allocation5 + $0x10] sm:$0xff] }
  0x2c   :  { %v1209_v11 = vld [vmem:[#allocation5 + $0x50] sm:$0xff]  ;;  %v1200_v12 = vld [vmem:[#allocation5 + $0x8] sm:$0xff]  ;;  %v1199_v14 = vld [vmem:[#allocation5] sm:$0xff] }
  0x2d   :  { %300 = vmatpush.bf16.msra.mxu0 %v1205_v2  ;;  %v1208_v13 = vld [vmem:[#allocation5 + $0x48] sm:$0xff]  ;;  %v1207_v15 = vld [vmem:[#allocation5 + $0x40] sm:$0xff]  ;;  %v167_v16 = vld [vmem:[#allocation2] sm:$0xff] }
  0x2e   :  { %313 = vmatpush.bf16.msra.mxu1 %v1213_v3  ;;  %v168_v17 = vld [vmem:[#allocation2 + $0x8] sm:$0xff]  ;;  %v169_v18 = vpack.c.bf16 %v167_v16, %v167_v16  ;;  %v1221_v21 = vld [vmem:[#allocation7 + $0x30] sm:$0xff]  ;;  %v1220_v22 = vld [vmem:[#allocation7 + $0x28] sm:$0xff] }
  0x2f   :  { %v170_v19 = vpack.c.bf16 %v168_v17, %v168_v17  ;;  %v1222_v20 = vld [vmem:[#allocation7 + $0x38] sm:$0xff]  ;;  %v1219_v23 = vld [vmem:[#allocation7 + $0x20] sm:$0xff]  ;;  %v1217_v28 = vld [vmem:[#allocation7 + $0x10] sm:$0xff] }
  0x30   :  { %433 = vmatpush.bf16.msra.mxu2 %v1222_v20  ;;  %v1218_v24 = vld [vmem:[#allocation7 + $0x18] sm:$0xff]  ;;  %v1216_v33 = vld [vmem:[#allocation7 + $0x8] sm:$0xff]  ;;  %v1215_v40 = vld [vmem:[#allocation7] sm:$0xff] }
  0x31   :  { %301 = vmatpush.bf16.msra.mxu0 %v1204_v4  ;;  %v343_v57 = vld [vmem:[%s1686_s2] sm:$0x1] }
  0x32   :  { %314 = vmatpush.bf16.msra.mxu1 %v1212_v5  ;;  %v356_v61 = vld [vmem:[%s1665_s3] sm:$0x1] }
  0x34   :  { %434 = vmatpush.bf16.msra.mxu2 %v1221_v21 }
  0x35   :  { %302 = vmatpush.bf16.msra.mxu0 %v1203_v6  ;;  %v1230_v6 = vld [vmem:[#allocation8 + $0x38] sm:$0xff] }
  0x36   :  { %315 = vmatpush.bf16.msra.mxu1 %v1211_v7  ;;  %554 = vmatpush.bf16.msra.mxu3 %v1230_v6  ;;  %v1229_v7 = vld [vmem:[#allocation8 + $0x30] sm:$0xff] }
  0x37   :  { %v1233_v6 = vld [vmem:[#allocation10 + $0x10] sm:$0xff] }
  0x38   :  { %435 = vmatpush.bf16.msra.mxu2 %v1220_v22 }
  0x39   :  { %303 = vmatpush.bf16.msra.mxu0 %v1202_v8  ;;  %v1228_v8 = vld [vmem:[#allocation8 + $0x28] sm:$0xff] }
  0x3a   :  { %316 = vmatpush.bf16.msra.mxu1 %v1210_v9  ;;  %555 = vmatpush.bf16.msra.mxu3 %v1229_v7  ;;  %v1227_v9 = vld [vmem:[#allocation8 + $0x20] sm:$0xff] }
  0x3c   :  { %436 = vmatpush.bf16.msra.mxu2 %v1219_v23 }
  0x3d   :  { %304 = vmatpush.bf16.msra.mxu0 %v1201_v10  ;;  %v1226_v10 = vld [vmem:[#allocation8 + $0x18] sm:$0xff] }
  0x3e   :  { %317 = vmatpush.bf16.msra.mxu1 %v1209_v11  ;;  %556 = vmatpush.bf16.msra.mxu3 %v1228_v8 }
  0x40   :  { %437 = vmatpush.bf16.msra.mxu2 %v1218_v24 }
  0x41   :  { %305 = vmatpush.bf16.msra.mxu0 %v1200_v12 }
  0x42   :  { %318 = vmatpush.bf16.msra.mxu1 %v1208_v13  ;;  %557 = vmatpush.bf16.msra.mxu3 %v1227_v9 }
  0x44   :  { %438 = vmatpush.bf16.msra.mxu2 %v1217_v28 }
  0x45   :  { %306 = vmatpush.bf16.msra.mxu0 %v1199_v14  ;;  %v1225_v14 = vld [vmem:[#allocation8 + $0x10] sm:$0xff] }
  0x46   :  { %319 = vmatpush.bf16.msra.mxu1 %v1207_v15  ;;  %558 = vmatpush.bf16.msra.mxu3 %v1226_v10 }
  0x48   :  { %307 = vmatmul.bf16.vlgmr.msra.gmra.mxu0 %v169_v18  ;;  %439 = vmatpush.bf16.msra.mxu2 %v1216_v33 }
  0x49   :  { %320 = vmatmul.bf16.vlgmr.msra.gmra.mxu1 %v170_v19  ;;  %v1224_v19 = vld [vmem:[#allocation8 + $0x8] sm:$0xff] }
  0x4a   :  { %559 = vmatpush.bf16.msra.mxu3 %v1225_v14  ;;  %v1231_v14 = vld [vmem:[#allocation10] sm:$0xff] }
  0x4c   :  { %440 = vmatpush.bf16.msra.mxu2 %v1215_v40  ;;  %v464_v40 = vld [vmem:[%s1667_s5] sm:$0x1] }
  0x4e   :  { %560 = vmatpush.bf16.msra.mxu3 %v1224_v19 }
  0xc5   :  { %v308_v25 = vpop.f32.mrf.mxu0 }
  0xc6   :  { %v321_v26 = vpop.f32.mrf.mxu1 }
  0xc7   :  { %v322_v27 = vadd.f32 %v321_v26, %v308_v25  ;;  %v1223_v25 = vld [vmem:[#allocation8] sm:$0xff] }
  0xc8   :  { %561 = vmatpush.bf16.msra.mxu3 %v1223_v25 }
  0xc9   :  { %v325_v29 = vrot.slane %v322_v27, 4  ;;  %v332_v30 = vmul.f32 %v322_v27, %v322_v27 }
  0xcb   :  { %v326_v31 = vadd.f32 %v325_v29, %v322_v27  ;;  %v333_v32 = vrot.slane %v332_v30, 4 }
  0xcd   :  { %v327_v34 = vrot.slane %v326_v31, 2  ;;  %v334_v35 = vadd.f32 %v333_v32, %v332_v30  ;;  %v310_v36 = vpop.f32.mrf.mxu0 }
  0xce   :  { %v323_v37 = vpop.f32.mrf.mxu1 }
  0xcf   :  { %v328_v38 = vadd.f32 %v327_v34, %v326_v31  ;;  %v335_v39 = vrot.slane %v334_v35, 2 }
  0xd1   :  { %v336_v41 = vadd.f32 %v335_v39, %v334_v35  ;;  %v329_v42 = vrot.slane %v328_v38, 1 }
  0xd3   :  { %v337_v43 = vrot.slane %v336_v41, 1  ;;  %v330_v44 = vadd.f32 %v329_v42, %v328_v38 }
  0xd5   :  { %v338_v45 = vadd.f32 %v337_v43, %v336_v41  ;;  %v331_v46 = vmul.f32 0.125, %v330_v44  ;;  %v477_v44 = vld [vmem:[%s1668_s6] sm:$0x1] }
  0xd7   :  { %v339_v47 = vmul.f32 0.125, %v338_v45  ;;  %v340_v48 = vmul.f32 %v331_v46, %v331_v46 }
  0xd9   :  { %v341_v49 = vsub.f32 %v339_v47, %v340_v48 }
  0xdb   :  { %v342_v50 = vmax.f32 %v341_v49, 0.0 }
  0xdd   :  { %v344_v51 = vadd.f32 1e-05, %v342_v50 }
  0xdf   :  { %1266 = vrsqrt.f32 %v344_v51  ;;  %vm351_vm1 = vweird.f32 %v344_v51 }
  0xe5   :  { %v1267_v52 = vpop.eup %1266 }
  0xe6   :  { %v346_v53 = vmul.f32 %v1267_v52, %v344_v51  ;;  %vm352_vm0 = vweird.f32 %v1267_v52 }
  0xe7   :  { %vm353_vm2 = vmor %vm351_vm1, %vm352_vm0 }
  0xe8   :  { %v347_v54 = vmul.f32 %v1267_v52, %v346_v53  ;;  %v1238_v53 = vld [vmem:[#allocation10 + $0x38] sm:$0xff] }
  0xe9   :  { %675 = vmatpush.bf16.msrb.mxu0 %v1238_v53  ;;  %v1241_v53 = vld [vmem:[#allocation11 + $0x10] sm:$0xff] }
  0xea   :  { %v348_v55 = vmul.f32 0.5, %v347_v54  ;;  %v1237_v54 = vld [vmem:[#allocation10 + $0x30] sm:$0xff] }
  0xec   :  { %v349_v56 = vsub.f32 1.5, %v348_v55  ;;  %v1236_v55 = vld [vmem:[#allocation10 + $0x28] sm:$0xff] }
  0xed   :  { %676 = vmatpush.bf16.msrb.mxu0 %v1237_v54 }
  0xee   :  { %v350_v58 = vmul.f32 %v1267_v52, %v349_v56 }
  0xf0   :  { %v354_v59 = vsel %vm353_vm2, %v1267_v52, %v350_v58 }
  0xf1   :  { %v355_v60 = vmul.f32 %v354_v59, %v343_v57  ;;  %677 = vmatpush.bf16.msrb.mxu0 %v1236_v55  ;;  %v1235_v59 = vld [vmem:[#allocation10 + $0x20] sm:$0xff] }
  0xf3   :  { %v357_v62 = vmul.f32 %v355_v60, %v331_v46  ;;  %v360_v63 = vperm.slane %v355_v60, 0 }
  0xf5   :  { %v358_v0 = vsub.f32 %v356_v61, %v357_v62  ;;  %v362_v1 = vmul.f32 %v360_v63, %v322_v27  ;;  %678 = vmatpush.bf16.msrb.mxu0 %v1235_v59 }
  0xf7   :  { %v364_v2 = vperm.slane %v358_v0, 0  ;;  %v1234_v0 = vld [vmem:[#allocation10 + $0x18] sm:$0xff] }
  0xf9   :  { %v366_v3 = vadd.f32 %v364_v2, %v362_v1  ;;  %679 = vmatpush.bf16.msrb.mxu0 %v1234_v0 }
  0xfb   :  { %v367_v4 = vmax.f32 %v366_v3, 0.0 }
  0xfd   :  { %v368_v5 = vpack.c.bf16 %v367_v4, %v367_v4  ;;  %680 = vmatpush.bf16.msrb.mxu0 %v1233_v6  ;;  %v706_v6 = vld [vmem:[%s1673_s11] sm:$0x1] }
  0xff   :  { %441 = vmatmul.bf16.vlgmr.msra.gmra.mxu2 %v368_v5 }
 0x182   :  { %v442_v11 = vpop.f32.mrf.mxu2 }
 0x183   :  { %v446_v12 = vrot.slane %v442_v11, 4  ;;  %v453_v13 = vmul.f32 %v442_v11, %v442_v11 }
 0x185   :  { %v447_v15 = vadd.f32 %v446_v12, %v442_v11  ;;  %v454_v16 = vrot.slane %v453_v13, 4 }
 0x187   :  { %v448_v17 = vrot.slane %v447_v15, 2  ;;  %v455_v18 = vadd.f32 %v454_v16, %v453_v13 }
 0x189   :  { %v449_v20 = vadd.f32 %v448_v17, %v447_v15  ;;  %v456_v21 = vrot.slane %v455_v18, 2 }
 0x18a   :  { %v444_v22 = vpop.f32.mrf.mxu2 }
 0x18b   :  { %v450_v23 = vrot.slane %v449_v20, 1  ;;  %v457_v24 = vadd.f32 %v456_v21, %v455_v18 }
 0x18d   :  { %v458_v26 = vrot.slane %v457_v24, 1  ;;  %v451_v27 = vadd.f32 %v450_v23, %v449_v20  ;;  %v585_v23 = vld [vmem:[%s1670_s8] sm:$0x1] }
 0x18f   :  { %v459_v28 = vadd.f32 %v458_v26, %v457_v24  ;;  %v452_v29 = vmul.f32 0.125, %v451_v27  ;;  %v598_v27 = vld [vmem:[%s1671_s9] sm:$0x1] }
 0x191   :  { %v460_v30 = vmul.f32 0.125, %v459_v28  ;;  %v461_v31 = vmul.f32 %v452_v29, %v452_v29 }
 0x193   :  { %v462_v32 = vsub.f32 %v460_v30, %v461_v31 }
 0x195   :  { %v463_v33 = vmax.f32 %v462_v32, 0.0 }
 0x197   :  { %v465_v34 = vadd.f32 1e-05, %v463_v33 }
 0x199   :  { %1268 = vrsqrt.f32 %v465_v34  ;;  %vm472_vm4 = vweird.f32 %v465_v34 }
 0x19f   :  { %v1269_v35 = vpop.eup %1268 }
 0x1a0   :  { %v467_v36 = vmul.f32 %v1269_v35, %v465_v34  ;;  %vm473_vm3 = vweird.f32 %v1269_v35 }
 0x1a1   :  { %vm474_vm5 = vmor %vm472_vm4, %vm473_vm3 }
 0x1a2   :  { %v468_v37 = vmul.f32 %v1269_v35, %v467_v36  ;;  %v1246_v36 = vld [vmem:[#allocation11 + $0x38] sm:$0xff] }
 0x1a3   :  { %796 = vmatpush.bf16.msrb.mxu1 %v1246_v36  ;;  %v1249_v36 = vld [vmem:[#allocation13 + $0x10] sm:$0xff] }
 0x1a4   :  { %v469_v38 = vmul.f32 0.5, %v468_v37  ;;  %v1245_v37 = vld [vmem:[#allocation11 + $0x30] sm:$0xff] }
 0x1a6   :  { %v470_v39 = vsub.f32 1.5, %v469_v38  ;;  %v1244_v38 = vld [vmem:[#allocation11 + $0x28] sm:$0xff] }
 0x1a7   :  { %797 = vmatpush.bf16.msrb.mxu1 %v1245_v37 }
 0x1a8   :  { %v471_v41 = vmul.f32 %v1269_v35, %v470_v39 }
 0x1aa   :  { %v475_v42 = vsel %vm474_vm5, %v1269_v35, %v471_v41 }
 0x1ab   :  { %v476_v43 = vmul.f32 %v475_v42, %v464_v40  ;;  %798 = vmatpush.bf16.msrb.mxu1 %v1244_v38  ;;  %v1243_v42 = vld [vmem:[#allocation11 + $0x20] sm:$0xff] }
 0x1ad   :  { %v478_v45 = vmul.f32 %v476_v43, %v452_v29  ;;  %v481_v46 = vperm.slane %v476_v43, 0 }
 0x1af   :  { %v479_v47 = vsub.f32 %v477_v44, %v478_v45  ;;  %v483_v48 = vmul.f32 %v481_v46, %v442_v11  ;;  %v1232_v11 = vld [vmem:[#allocation10 + $0x8] sm:$0xff]  ;;  %799 = vmatpush.bf16.msrb.mxu1 %v1243_v42 }
 0x1b0   :  { %681 = vmatpush.bf16.msrb.mxu0 %v1232_v11 }
 0x1b1   :  { %v485_v49 = vperm.slane %v479_v47, 0  ;;  %v1242_v47 = vld [vmem:[#allocation11 + $0x18] sm:$0xff] }
 0x1b3   :  { %v487_v50 = vadd.f32 %v485_v49, %v483_v48  ;;  %800 = vmatpush.bf16.msrb.mxu1 %v1242_v47 }
 0x1b4   :  { %682 = vmatpush.bf16.msrb.mxu0 %v1231_v14 }
 0x1b5   :  { %v488_v51 = vmax.f32 %v487_v50, 0.0 }
 0x1b7   :  { %v489_v52 = vpack.c.bf16 %v488_v51, %v488_v51  ;;  %801 = vmatpush.bf16.msrb.mxu1 %v1241_v53  ;;  %v827_v53 = vld [vmem:[%s1676_s14] sm:$0x1] }
 0x1b9   :  { %562 = vmatmul.bf16.vlgmr.msra.gmra.mxu3 %v489_v52 }
 0x23c   :  { %v563_v56 = vpop.f32.mrf.mxu3 }
 0x23d   :  { %v567_v57 = vrot.slane %v563_v56, 4  ;;  %v574_v58 = vmul.f32 %v563_v56, %v563_v56 }
 0x23f   :  { %v568_v60 = vadd.f32 %v567_v57, %v563_v56  ;;  %v575_v61 = vrot.slane %v574_v58, 4 }
 0x241   :  { %v569_v62 = vrot.slane %v568_v60, 2  ;;  %v576_v63 = vadd.f32 %v575_v61, %v574_v58  ;;  %v1240_v58 = vld [vmem:[#allocation11 + $0x8] sm:$0xff]  ;;  %v1239_v61 = vld [vmem:[#allocation11] sm:$0xff] }
 0x242   :  { %802 = vmatpush.bf16.msrb.mxu1 %v1240_v58 }
 0x243   :  { %v570_v1 = vadd.f32 %v569_v62, %v568_v60  ;;  %v577_v2 = vrot.slane %v576_v63, 2 }
 0x244   :  { %v565_v3 = vpop.f32.mrf.mxu3 }
 0x245   :  { %v571_v4 = vrot.slane %v570_v1, 1  ;;  %v578_v5 = vadd.f32 %v577_v2, %v576_v63 }
 0x246   :  { %803 = vmatpush.bf16.msrb.mxu1 %v1239_v61 }
 0x247   :  { %v572_v7 = vadd.f32 %v571_v4, %v570_v1  ;;  %v579_v8 = vrot.slane %v578_v5, 1 }
 0x249   :  { %v573_v9 = vmul.f32 0.125, %v572_v7  ;;  %v580_v10 = vadd.f32 %v579_v8, %v578_v5 }
 0x24b   :  { %v581_v12 = vmul.f32 0.125, %v580_v10  ;;  %v582_v13 = vmul.f32 %v573_v9, %v573_v9  ;;  %v719_v10 = vld [vmem:[%s1674_s12] sm:$0x1] }
 0x24d   :  { %v583_v15 = vsub.f32 %v581_v12, %v582_v13 }
 0x24f   :  { %v584_v16 = vmax.f32 %v583_v15, 0.0 }
 0x251   :  { %v586_v17 = vadd.f32 1e-05, %v584_v16 }
 0x253   :  { %1270 = vrsqrt.f32 %v586_v17  ;;  %vm593_vm7 = vweird.f32 %v586_v17 }
 0x259   :  { %v1271_v18 = vpop.eup %1270 }
 0x25a   :  { %v588_v19 = vmul.f32 %v1271_v18, %v586_v17  ;;  %vm594_vm6 = vweird.f32 %v1271_v18 }
 0x25b   :  { %vm595_vm8 = vmor %vm593_vm7, %vm594_vm6 }
 0x25c   :  { %v589_v20 = vmul.f32 %v1271_v18, %v588_v19  ;;  %v1254_v19 = vld [vmem:[#allocation13 + $0x38] sm:$0xff] }
 0x25d   :  { %921 = vmatpush.bf16.msrb.mxu2 %v1254_v19 }
 0x25e   :  { %v590_v21 = vmul.f32 0.5, %v589_v20  ;;  %v1253_v20 = vld [vmem:[#allocation13 + $0x30] sm:$0xff] }
 0x260   :  { %v591_v22 = vsub.f32 1.5, %v590_v21  ;;  %v1252_v21 = vld [vmem:[#allocation13 + $0x28] sm:$0xff] }
 0x261   :  { %922 = vmatpush.bf16.msrb.mxu2 %v1253_v20 }
 0x262   :  { %v592_v24 = vmul.f32 %v1271_v18, %v591_v22 }
 0x264   :  { %v596_v25 = vsel %vm595_vm8, %v1271_v18, %v592_v24 }
 0x265   :  { %v597_v26 = vmul.f32 %v596_v25, %v585_v23  ;;  %923 = vmatpush.bf16.msrb.mxu2 %v1252_v21  ;;  %v1251_v25 = vld [vmem:[#allocation13 + $0x20] sm:$0xff] }
 0x267   :  { %v602_v28 = vperm.slane %v597_v26, 0  ;;  %v599_v29 = vmul.f32 %v597_v26, %v573_v9 }
 0x269   :  { %v600_v30 = vsub.f32 %v598_v27, %v599_v29  ;;  %v604_v31 = vmul.f32 %v602_v28, %v563_v56  ;;  %924 = vmatpush.bf16.msrb.mxu2 %v1251_v25 }
 0x26b   :  { %v606_v32 = vperm.slane %v600_v30, 0  ;;  %v1250_v30 = vld [vmem:[#allocation13 + $0x18] sm:$0xff] }
 0x26d   :  { %v608_v33 = vadd.f32 %v606_v32, %v604_v31  ;;  %925 = vmatpush.bf16.msrb.mxu2 %v1250_v30 }
 0x26f   :  { %v609_v34 = vmax.f32 %v608_v33, 0.0 }
 0x271   :  { %v610_v35 = vpack.c.bf16 %v609_v34, %v609_v34  ;;  %926 = vmatpush.bf16.msrb.mxu2 %v1249_v36 }
 0x273   :  { %683 = vmatmul.bf16.vlgmr.msrb.gmra.mxu0 %v610_v35 }
 0x2f0   :  { %v684_v39 = vpop.f32.mrf.mxu0 }
 0x2f1   :  { %v688_v40 = vrot.slane %v684_v39, 4  ;;  %v695_v41 = vmul.f32 %v684_v39, %v684_v39 }
 0x2f3   :  { %v689_v43 = vadd.f32 %v688_v40, %v684_v39  ;;  %v696_v44 = vrot.slane %v695_v41, 4 }
 0x2f5   :  { %v690_v45 = vrot.slane %v689_v43, 2  ;;  %v697_v46 = vadd.f32 %v696_v44, %v695_v41  ;;  %v1248_v41 = vld [vmem:[#allocation13 + $0x8] sm:$0xff]  ;;  %v1247_v44 = vld [vmem:[#allocation13] sm:$0xff] }
 0x2f6   :  { %927 = vmatpush.bf16.msrb.mxu2 %v1248_v41 }
 0x2f7   :  { %v691_v48 = vadd.f32 %v690_v45, %v689_v43  ;;  %v698_v49 = vrot.slane %v697_v46, 2 }
 0x2f8   :  { %v686_v50 = vpop.f32.mrf.mxu0 }
 0x2f9   :  { %v692_v51 = vrot.slane %v691_v48, 1  ;;  %v699_v52 = vadd.f32 %v698_v49, %v697_v46 }
 0x2fa   :  { %928 = vmatpush.bf16.msrb.mxu2 %v1247_v44 }
 0x2fb   :  { %v693_v54 = vadd.f32 %v692_v51, %v691_v48  ;;  %v700_v55 = vrot.slane %v699_v52, 1 }
 0x2fd   :  { %v694_v56 = vmul.f32 0.125, %v693_v54  ;;  %v701_v57 = vadd.f32 %v700_v55, %v699_v52 }
 0x2ff   :  { %v702_v59 = vmul.f32 0.125, %v701_v57  ;;  %v703_v60 = vmul.f32 %v694_v56, %v694_v56  ;;  %v840_v57 = vld [vmem:[%s1677_s15] sm:$0x1]  ;;  %s1491_s15 = smov [#allocation14]  }
 0x300   :  { %s959_s1 = sshll.u32 %s1491_s15, 4  ;;  %s960_s1 = int_to_ptr.vmem [resolvable:$true] %s959_s1 }
 0x301   :  { %v704_v62 = vsub.f32 %v702_v59, %v703_v60 }
 0x303   :  { %v705_v63 = vmax.f32 %v704_v62, 0.0 }
 0x305   :  { %v707_v0 = vadd.f32 1e-05, %v705_v63 }
 0x307   :  { %1272 = vrsqrt.f32 %v707_v0  ;;  %vm714_vm10 = vweird.f32 %v707_v0 }
 0x30d   :  { %v1273_v1 = vpop.eup %1272 }
 0x30e   :  { %v709_v2 = vmul.f32 %v1273_v1, %v707_v0  ;;  %vm715_vm9 = vweird.f32 %v1273_v1 }
 0x30f   :  { %vm716_vm11 = vmor %vm714_vm10, %vm715_vm9 }
 0x310   :  { %v710_v3 = vmul.f32 %v1273_v1, %v709_v2  ;;  %v1265_v2 = vld [vmem:[%s1679_s17] ss:$0 sm:$0xff]  ;;  %s961_s17 = sshll.u32 %s1680_s18, 4  ;;  %s962_s17 = int_to_ptr.hbm [resolvable:$true] %s961_s17 }
 0x312   :  { %v711_v4 = vmul.f32 0.5, %v710_v3 }
 0x314   :  { %v712_v5 = vsub.f32 1.5, %v711_v4 }
 0x316   :  { %v713_v7 = vmul.f32 %v1273_v1, %v712_v5 }
 0x318   :  { %v717_v8 = vsel %vm716_vm11, %v1273_v1, %v713_v7 }
 0x319   :  { %v718_v9 = vmul.f32 %v717_v8, %v706_v6 }
 0x31b   :  { %v723_v11 = vperm.slane %v718_v9, 0  ;;  %v720_v12 = vmul.f32 %v718_v9, %v694_v56 }
 0x31d   :  { %v721_v13 = vsub.f32 %v719_v10, %v720_v12  ;;  %v725_v14 = vmul.f32 %v723_v11, %v684_v39 }
 0x31f   :  { %v727_v15 = vperm.slane %v721_v13, 0 }
 0x321   :  { %v729_v16 = vadd.f32 %v727_v15, %v725_v14 }
 0x323   :  { %v730_v17 = vmax.f32 %v729_v16, 0.0 }
 0x325   :  { %v731_v18 = vpack.c.bf16 %v730_v17, %v730_v17 }
 0x327   :  { %804 = vmatmul.bf16.vlgmr.msrb.gmra.mxu1 %v731_v18 }
 0x3a4   :  { %v805_v22 = vpop.f32.mrf.mxu1 }
 0x3a5   :  { %v809_v23 = vrot.slane %v805_v22, 4  ;;  %v816_v24 = vmul.f32 %v805_v22, %v805_v22 }
 0x3a7   :  { %v810_v26 = vadd.f32 %v809_v23, %v805_v22  ;;  %v817_v27 = vrot.slane %v816_v24, 4 }
 0x3a9   :  { %v811_v28 = vrot.slane %v810_v26, 2  ;;  %v818_v29 = vadd.f32 %v817_v27, %v816_v24 }
 0x3ab   :  { %v812_v31 = vadd.f32 %v811_v28, %v810_v26  ;;  %v819_v32 = vrot.slane %v818_v29, 2 }
 0x3ac   :  { %v807_v33 = vpop.f32.mrf.mxu1 }
 0x3ad   :  { %v813_v34 = vrot.slane %v812_v31, 1  ;;  %v820_v35 = vadd.f32 %v819_v32, %v818_v29 }
 0x3af   :  { %v814_v37 = vadd.f32 %v813_v34, %v812_v31  ;;  %v821_v38 = vrot.slane %v820_v35, 1 }
 0x3b1   :  { %v815_v39 = vmul.f32 0.125, %v814_v37  ;;  %v822_v40 = vadd.f32 %v821_v38, %v820_v35 }
 0x3b3   :  { %v823_v42 = vmul.f32 0.125, %v822_v40  ;;  %v824_v43 = vmul.f32 %v815_v39, %v815_v39 }
 0x3b5   :  { %v825_v45 = vsub.f32 %v823_v42, %v824_v43 }
 0x3b7   :  { %v826_v46 = vmax.f32 %v825_v45, 0.0 }
 0x3b9   :  { %v828_v47 = vadd.f32 1e-05, %v826_v46 }
 0x3bb   :  { %1274 = vrsqrt.f32 %v828_v47  ;;  %vm835_vm13 = vweird.f32 %v828_v47 }
 0x3c1   :  { %v1275_v48 = vpop.eup %1274 }
 0x3c2   :  { %v830_v49 = vmul.f32 %v1275_v48, %v828_v47  ;;  %vm836_vm12 = vweird.f32 %v1275_v48 }
 0x3c3   :  { %vm837_vm14 = vmor %vm835_vm13, %vm836_vm12 }
 0x3c4   :  { %v831_v50 = vmul.f32 %v1275_v48, %v830_v49 }
 0x3c6   :  { %v832_v51 = vmul.f32 0.5, %v831_v50 }
 0x3c8   :  { %v833_v52 = vsub.f32 1.5, %v832_v51 }
 0x3ca   :  { %v834_v54 = vmul.f32 %v1275_v48, %v833_v52 }
 0x3cc   :  { %v838_v55 = vsel %vm837_vm14, %v1275_v48, %v834_v54 }
 0x3cd   :  { %v839_v56 = vmul.f32 %v838_v55, %v827_v53 }
 0x3cf   :  { %v844_v58 = vperm.slane %v839_v56, 0  ;;  %v841_v59 = vmul.f32 %v839_v56, %v815_v39 }
 0x3d1   :  { %v842_v60 = vsub.f32 %v840_v57, %v841_v59  ;;  %v846_v61 = vmul.f32 %v844_v58, %v805_v22 }
 0x3d3   :  { %v848_v62 = vperm.slane %v842_v60, 0 }
 0x3d5   :  { %v850_v63 = vadd.f32 %v848_v62, %v846_v61 }
 0x3d7   :  { %v851_v0 = vmax.f32 %v850_v63, 0.0 }
 0x3d9   :  { %v852_v1 = vpack.c.bf16 %v851_v0, %v851_v0 }
 0x3db   :  { %929 = vmatmul.bf16.vlgmr.msrb.gmra.mxu2 %v852_v1 }
 0x45e   :  { %v930_v3 = vpop.f32.mrf.mxu2 }
 0x45f   :  { %v931_v4 = vadd.f32 %v1265_v2, %v930_v3 }
 0x461   :  { %v1198_v5 = vmul.f32 -1.442695, %v931_v4 }
 0x463   :  { %1276 = vpow2.f32 %v1198_v5 }
 0x466   :  { %v932_v6 = vpop.f32.mrf.mxu2 }
 0x469   :  { %v1277_v7 = vpop.eup %1276 }
 0x46a   :  { %v937_v8 = vadd.f32 1.0, %v1277_v7 }
 0x46c   :  { %1278 = vrcp.f32 %v937_v8  ;;  %v949_v12 = vand.u32 2147483648, %v937_v8  ;;  %v947_v14 = vand.u32 2147483647, %v937_v8  ;;  %vm943_vm0 = vweird.f32 %v937_v8 }
 0x46e   :  { %v950_v16 = vor.u32 1.1754944e-38, %v949_v12  ;;  %vm948_vm2 = vcmp.eq.f32.partialorder %v947_v14, 8.507059e+37 }
 0x472   :  { %v1279_v9 = vpop.eup %1278 }
 0x473   :  { %v939_v10 = vmul.f32 %v1279_v9, %v937_v8  ;;  %vm944_vm15 = vweird.f32 %v1279_v9 }
 0x474   :  { %vm945_vm1 = vmor %vm943_vm0, %vm944_vm15 }
 0x475   :  { %v940_v11 = vsub.f32 1.0, %v939_v10 }
 0x477   :  { %v941_v13 = vmul.f32 %v1279_v9, %v940_v11 }
 0x479   :  { %v942_v15 = vadd.f32 %v1279_v9, %v941_v13 }
 0x47b   :  { %v946_v17 = vsel %vm945_vm1, %v1279_v9, %v942_v15 }
 0x47c   :  { %v951_v18 = vsel %vm948_vm2, %v950_v16, %v946_v17 }
 0x47d   :  { %953 = vst [vmem:[#allocation14] sm:$0xff] %v951_v18 }
 0x47e   :  { %964 = dma.vmem_to_hbm [thread:$0]  %s960_s1, 128, %s962_s17, [#allocation4]  }
 0x47f   :  { %1480 = dma.done.wait [#allocation4], 128  }
 0x480   :  { %1481 = vsyncadd [#allocation4], 4294967168 }
 0x481   :  { %969 = vsyncpa [#allocation3], 1 }
 0x482   :  { %970 = vsyncpa [#allocation6], 1 }
 0x483   :  { %971 = vsyncpa [#allocation9], 1 }
 0x484   :  { %972 = vsyncpa [#allocation12], 1 }
 0x485   :  { %973 = vsyncpa [#allocation4], 1 }

</bundles_post_ra>
